<compile_context>
chip_gen: v5e
topology: v5e:2x2
jax: 0.10.0
libtpu: 0.0.40
codegen_flags: <defaults>
</compile_context>

<pallas_src>
import functools

import numpy as np
import jax
import jax.numpy as jnp
from jax.experimental import pallas as pl
from jax.experimental.pallas import tpu as pltpu


def _round_up(x, m):
    return (x + m - 1) // m * m


# --------------------------------------------------------------------------- #
# Pallas kernel
# --------------------------------------------------------------------------- #
def _ssce_kernel(f_ref, pt_ref, psq_ref, dom_ref, out_ref, *,
                 n_valid, tile_n, tiles_per_split):
    """One batch tile: negative-Euclidean logits + cross-entropy partial sum.

    f_ref   : [TILE_N, D] f32   features (ragged last tile has garbage rows)
    pt_ref  : [D, P]      f32   class prototypes, transposed (grid-resident)
    psq_ref : [1, P]      f32   hoisted ||p_j||^2 (grid-resident)
    dom_ref : [TILE_N, 1] i32   target class per row
    out_ref : [1, 1, 1]   f32   per-split VMEM-resident partial accumulator
    """
    c = pl.program_id(0)          # core-split axis ("parallel")
    i = pl.program_id(1)          # batch-tile axis ("arbitrary" reduction)

    @pl.when(i == 0)
    def _init():
        out_ref[...] = jnp.zeros_like(out_ref)

    f = f_ref[...]                                            # [TN, D]
    pt = pt_ref[...]                                          # [D, P]
    p_sq = psq_ref[...]                                       # [1, P]
    dom = dom_ref[...]                                        # [TN, 1]

    # Squared-distance expansion: the only O(TN*P*D) op is one MXU matmul.
    f_sq = jnp.sum(f * f, axis=1, keepdims=True)              # [TN, 1]
    fp = jnp.dot(f, pt, preferred_element_type=jnp.float32)   # [TN, P]
    d2 = jnp.maximum(f_sq + p_sq - 2.0 * fp, 0.0)
    sim = -jnp.sqrt(d2)                                       # logits [TN, P]

    # Cross entropy with in-kernel one-hot gather of the target logit.
    col = jax.lax.broadcasted_iota(jnp.int32, sim.shape, 1)   # [TN, P]
    tgt = jnp.sum(jnp.where(col == dom, sim, 0.0), axis=1, keepdims=True)
    m = jnp.max(sim, axis=1, keepdims=True)
    lse = m + jnp.log(jnp.sum(jnp.exp(sim - m), axis=1, keepdims=True))
    row_loss = lse - tgt                                      # [TN, 1]

    # Mask ragged-last-tile garbage rows AND duplicate (clamped) tiles: the
    # logical row index is built from the UNclamped global tile id, so any
    # block replayed past the real tile range contributes exactly zero.
    gtile = c * tiles_per_split + i
    row = gtile * tile_n + jax.lax.broadcasted_iota(jnp.int32, row_loss.shape, 0)
    row_loss = jnp.where(row < n_valid, row_loss, 0.0)

    out_ref[...] += jnp.sum(row_loss, axis=0, keepdims=True).reshape(out_ref.shape)


# --------------------------------------------------------------------------- #
# Wrapper
# --------------------------------------------------------------------------- #
def single_side_ce_loss(features, class_prototypes, domain, *,
                        tile_n=None, num_core_splits=2):
    f = jnp.asarray(features, jnp.float32)                    # [N, D]
    p = jnp.asarray(class_prototypes, jnp.float32)            # [P, D]
    dom = jnp.asarray(domain, jnp.int32).reshape(-1, 1)       # [N, 1]

    N, D = f.shape
    P = p.shape[0]

    # Batch tile: target a ~1.5 MiB feature block (using the lane-padded width
    # for the arithmetic), clamped to 512..2048 rows, sublane-aligned, and no
    # larger than the (rounded-up) batch itself.
    if tile_n is None:
        t = (3 << 19) // max(4 * max(D, 128), 1)
        t = max(512, min(2048, t))
    else:
        t = tile_n
    tn = min(_round_up(t, 8), _round_up(N, 8))

    num_tiles = pl.cdiv(N, tn)
    n_split = num_core_splits if num_tiles >= num_core_splits else 1
    tpc = pl.cdiv(num_tiles, n_split)                         # tiles per split
    last_tile = num_tiles - 1

    # Tiny prototype-side precomputes (hoisted out of the per-tile body).
    pt = p.T                                                  # [D, P]
    p_sq = jnp.sum(p * p, axis=1, keepdims=True).T            # [1, P]

    kernel = functools.partial(_ssce_kernel, n_valid=N, tile_n=tn,
                               tiles_per_split=tpc)

    def tile_map(c, i):
        # Clamp so a padded grid step never issues a fully out-of-bounds DMA;
        # the kernel masks such steps out via the unclamped logical row index.
        return (jnp.minimum(c * tpc + i, last_tile), 0)

    # Rough per-step VMEM budget (double-buffered, lane-padded); only raise the
    # scoped limit when the default 16 MiB (v5e) would be exceeded.
    est_vmem = (2 * tn * _round_up(D, 128) * 4      # features
                + 2 * tn * 128 * 4                  # domain ([tn,1] lane-pads)
                + 2 * _round_up(D, 8) * 128 * 4     # prototypes
                + 8 * tn * 128 * 4)                 # [tn,P]-shaped temporaries
    cp_kwargs = dict(dimension_semantics=("parallel", "arbitrary"))
    if est_vmem > (12 << 20):
        cp_kwargs["vmem_limit_bytes"] = int(min(est_vmem + (4 << 20), 48 << 20))

    cost = pl.CostEstimate(
        flops=2 * N * P * D,
        transcendentals=N * (2 * P + 1),
        bytes_accessed=N * D * 4 + N * 4 + 2 * P * D * 4 + n_split * 4,
    )

    partials = pl.pallas_call(
        kernel,
        out_shape=jax.ShapeDtypeStruct((n_split, 1, 1), jnp.float32),
        grid_spec=pltpu.PrefetchScalarGridSpec(
            num_scalar_prefetch=0,
            grid=(n_split, tpc),
            in_specs=[
                pl.BlockSpec((tn, D), tile_map),               # features tile
                pl.BlockSpec((D, P), lambda c, i: (0, 0)),     # prototypes^T
                pl.BlockSpec((1, P), lambda c, i: (0, 0)),     # ||p||^2
                pl.BlockSpec((tn, 1), tile_map),               # domain tile
            ],
            out_specs=pl.BlockSpec((1, 1, 1), lambda c, i: (c, 0, 0)),
        ),
        compiler_params=pltpu.CompilerParams(**cp_kwargs),
        cost_estimate=cost,
    )(f, pt, p_sq, dom)

    # Combine the per-split partial sums and apply the mean exactly once.
    return jnp.sum(partials) / jnp.float32(N)


# --------------------------------------------------------------------------- #
# Pure-numpy reference (faithful transcription of the torch forward)
# --------------------------------------------------------------------------- #
def _reference_loss(features, prototypes, domain):
    f = np.asarray(features, np.float64)
    p = np.asarray(prototypes, np.float64)
    dom = np.asarray(domain)
    N, P = f.shape[0], p.shape[0]

    d = np.zeros((N, P), np.float64)
    for i in range(N):                       # literal EU_dist double loop
        for j in range(P):
            diff = f[i] - p[j]
            d[i, j] = np.sqrt(np.dot(diff, diff))
    sim = -d

    m = sim.max(axis=1, keepdims=True)
    lse = m[:, 0] + np.log(np.exp(sim - m).sum(axis=1))
    tgt = sim[np.arange(N), dom]
    return np.mean(lse - tgt)                # CrossEntropyLoss (mean reduction)


# --------------------------------------------------------------------------- #
if __name__ == "__main__":
    key = jax.random.PRNGKey(0)

    ok = True
    # (N, D, P, tile_n): second case exercises multi-tile grid, the 2-way
    # core split, the clamped padding step and the ragged last tile.
    for (N, D, P, tn) in [(16, 32, 3, None), (37, 32, 3, 8)]:
        kf, kp, kd, key = jax.random.split(key, 4)
        features = jax.random.normal(kf, (N, D), jnp.float32)
        prototypes = jax.random.normal(kp, (P, D), jnp.float32)
        domain = jax.random.randint(kd, (N,), 0, P, jnp.int32)

        loss = single_side_ce_loss(features, prototypes, domain, tile_n=tn)
        loss = jax.block_until_ready(loss)

        ref = _reference_loss(np.asarray(features), np.asarray(prototypes),
                              np.asarray(domain))

        assert np.isfinite(float(loss)), "kernel produced non-finite loss"
        assert np.allclose(float(loss), float(ref), rtol=1e-3, atol=1e-4), (
            f"mismatch (N={N}, tile={tn}): kernel={float(loss)} ref={float(ref)}")

    if ok:
        print("KERNEL_OK")
</pallas_src>

<mosaic_0001>
module attributes {stable_mosaic.version = 11 : i64} {
  func.func @_ssce_kernel(%arg0: i32, %arg1: i32, %arg2: memref<16x32xf32, #tpu.memory_space<vmem>>, %arg3: memref<32x3xf32, #tpu.memory_space<vmem>>, %arg4: memref<1x3xf32, #tpu.memory_space<vmem>>, %arg5: memref<16x1xi32, #tpu.memory_space<vmem>>, %arg6: memref<1x1x1xf32, #tpu.memory_space<vmem>>) attributes {dimension_semantics = [#tpu.dimension_semantics<parallel>, #tpu.dimension_semantics<arbitrary>], iteration_bounds = array<i64: 1, 1>, scalar_prefetch = 0 : i64, scratch_operands = 0 : i64, tpu.core_type = #tpu.core_type<tc>, window_params = [{transform_indices = @transform_0, window_bounds = array<i64: 16, 32>}, {pipeline_mode = #tpu.pipeline_mode<synchronous>, transform_indices = @transform_1, window_bounds = array<i64: 32, 3>}, {pipeline_mode = #tpu.pipeline_mode<synchronous>, transform_indices = @transform_2, window_bounds = array<i64: 1, 3>}, {transform_indices = @transform_3, window_bounds = array<i64: 16, 1>}, {transform_indices = @transform_4, window_bounds = array<i64: 1, 1, 1>}]} {
    %c0_i32 = arith.constant 0 : i32
    %0 = arith.cmpi eq, %arg1, %c0_i32 : i32
    %1 = arith.extui %0 : i1 to i32
    %c0_i32_0 = arith.constant 0 : i32
    %2 = arith.cmpi ne, %1, %c0_i32_0 : i32
    scf.if %2 {
      %cst_25 = arith.constant 0.000000e+00 : f32
      %55 = vector.broadcast %cst_25 : f32 to vector<1x1x1xf32>
      %c0_26 = arith.constant 0 : index
      %c0_27 = arith.constant 0 : index
      %c0_28 = arith.constant 0 : index
      %56 = vector.load %arg6[%c0_26, %c0_27, %c0_28] : memref<1x1x1xf32, #tpu.memory_space<vmem>>, vector<1x1x1xf32>
      tpu.vector_store %arg6[%c0_26, %c0_27, %c0_28], %55 {strides = array<i32>} : memref<1x1x1xf32, #tpu.memory_space<vmem>>, vector<1x1x1xf32>,
    } else {
    }
    %c0 = arith.constant 0 : index
    %c0_1 = arith.constant 0 : index
    %3 = vector.load %arg2[%c0, %c0_1] : memref<16x32xf32, #tpu.memory_space<vmem>>, vector<16x32xf32>
    %c0_2 = arith.constant 0 : index
    %c0_3 = arith.constant 0 : index
    %4 = vector.load %arg3[%c0_2, %c0_3] : memref<32x3xf32, #tpu.memory_space<vmem>>, vector<32x3xf32>
    %c0_4 = arith.constant 0 : index
    %c0_5 = arith.constant 0 : index
    %5 = vector.load %arg4[%c0_4, %c0_5] : memref<1x3xf32, #tpu.memory_space<vmem>>, vector<1x3xf32>
    %c0_6 = arith.constant 0 : index
    %c0_7 = arith.constant 0 : index
    %6 = vector.load %arg5[%c0_6, %c0_7] : memref<16x1xi32, #tpu.memory_space<vmem>>, vector<16x1xi32>
    %7 = arith.mulf %3, %3 : vector<16x32xf32>
    %cst = arith.constant dense<0.000000e+00> : vector<16xf32>
    %8 = vector.multi_reduction <add>, %7, %cst [1] : vector<16x32xf32> to vector<16xf32>
    %9 = vector.shape_cast %8 : vector<16xf32> to vector<16x1xf32>
    %cst_8 = arith.constant dense<0.000000e+00> : vector<16x3xf32>
    %10 = tpu.matmul %3, %4, %cst_8 {dimension_numbers = #tpu.dot_dimension_numbers<[1], [0], [0], [1], [0, 0, 1, 1], [], []>} : vector<16x32xf32>, vector<32x3xf32>, vector<16x3xf32> -> vector<16x3xf32>
    %11 = vector.broadcast %9 : vector<16x1xf32> to vector<16x3xf32>
    %12 = vector.broadcast %5 : vector<1x3xf32> to vector<16x3xf32>
    %13 = arith.addf %11, %12 : vector<16x3xf32>
    %cst_9 = arith.constant 2.000000e+00 : f32
    %14 = vector.broadcast %cst_9 : f32 to vector<16x3xf32>
    %15 = arith.mulf %14, %10 : vector<16x3xf32>
    %16 = arith.subf %13, %15 : vector<16x3xf32>
    %cst_10 = arith.constant 0.000000e+00 : f32
    %17 = vector.broadcast %cst_10 : f32 to vector<16x3xf32>
    %18 = arith.maximumf %16, %17 : vector<16x3xf32>
    %19 = math.sqrt %18 : vector<16x3xf32>
    %cst_11 = arith.constant 0.000000e+00 : f32
    %20 = vector.broadcast %cst_11 : f32 to vector<16x3xf32>
    %21 = arith.subf %20, %19 : vector<16x3xf32>
    %22 = tpu.iota {dimensions = array<i32: 1>} : vector<16x3xi32>
    %23 = vector.broadcast %6 : vector<16x1xi32> to vector<16x3xi32>
    %24 = arith.cmpi eq, %22, %23 : vector<16x3xi32>
    %cst_12 = arith.constant 0.000000e+00 : f32
    %25 = vector.broadcast %cst_12 : f32 to vector<16x3xf32>
    %26 = arith.select %24, %21, %25 : vector<16x3xi1>, vector<16x3xf32>
    %cst_13 = arith.constant dense<0.000000e+00> : vector<16xf32>
    %27 = vector.multi_reduction <add>, %26, %cst_13 [1] : vector<16x3xf32> to vector<16xf32>
    %28 = vector.shape_cast %27 : vector<16xf32> to vector<16x1xf32>
    %cst_14 = arith.constant dense<0xFF800000> : vector<16xf32>
    %29 = vector.multi_reduction <maximumf>, %21, %cst_14 [1] : vector<16x3xf32> to vector<16xf32>
    %30 = vector.shape_cast %29 : vector<16xf32> to vector<16x1xf32>
    %31 = vector.broadcast %30 : vector<16x1xf32> to vector<16x3xf32>
    %32 = arith.subf %21, %31 : vector<16x3xf32>
    %33 = math.exp %32 : vector<16x3xf32>
    %cst_15 = arith.constant dense<0.000000e+00> : vector<16xf32>
    %34 = vector.multi_reduction <add>, %33, %cst_15 [1] : vector<16x3xf32> to vector<16xf32>
    %35 = vector.shape_cast %34 : vector<16xf32> to vector<16x1xf32>
    %36 = math.log %35 : vector<16x1xf32>
    %37 = arith.addf %30, %36 : vector<16x1xf32>
    %38 = arith.subf %37, %28 : vector<16x1xf32>
    %c1_i32 = arith.constant 1 : i32
    %39 = arith.muli %arg0, %c1_i32 : i32
    %40 = arith.addi %39, %arg1 : i32
    %c16_i32 = arith.constant 16 : i32
    %41 = arith.muli %40, %c16_i32 : i32
    %42 = tpu.iota {dimensions = array<i32: 0>} : vector<16x1xi32>
    %43 = vector.broadcast %41 : i32 to vector<16x1xi32>
    %44 = arith.addi %43, %42 : vector<16x1xi32>
    %c16_i32_16 = arith.constant 16 : i32
    %45 = vector.broadcast %c16_i32_16 : i32 to vector<16x1xi32>
    %46 = arith.cmpi slt, %44, %45 : vector<16x1xi32>
    %cst_17 = arith.constant 0.000000e+00 : f32
    %47 = vector.broadcast %cst_17 : f32 to vector<16x1xf32>
    %48 = arith.select %46, %38, %47 : vector<16x1xi1>, vector<16x1xf32>
    %c0_18 = arith.constant 0 : index
    %c0_19 = arith.constant 0 : index
    %c0_20 = arith.constant 0 : index
    %49 = vector.load %arg6[%c0_18, %c0_19, %c0_20] : memref<1x1x1xf32, #tpu.memory_space<vmem>>, vector<1x1x1xf32>
    %cst_21 = arith.constant dense<0.000000e+00> : vector<1xf32>
    %50 = vector.multi_reduction <add>, %48, %cst_21 [0] : vector<16x1xf32> to vector<1xf32>
    %51 = vector.shape_cast %50 : vector<1xf32> to vector<1x1xf32>
    %52 = vector.shape_cast %51 : vector<1x1xf32> to vector<1x1x1xf32>
    %53 = arith.addf %49, %52 : vector<1x1x1xf32>
    %c0_22 = arith.constant 0 : index
    %c0_23 = arith.constant 0 : index
    %c0_24 = arith.constant 0 : index
    %54 = vector.load %arg6[%c0_22, %c0_23, %c0_24] : memref<1x1x1xf32, #tpu.memory_space<vmem>>, vector<1x1x1xf32>
    tpu.vector_store %arg6[%c0_22, %c0_23, %c0_24], %53 {strides = array<i32>} : memref<1x1x1xf32, #tpu.memory_space<vmem>>, vector<1x1x1xf32>,
    return
  }
  func.func @transform_0(%arg0: i32, %arg1: i32) -> (i32, i32) {
    %c1_i32 = arith.constant 1 : i32
    %0 = arith.muli %arg0, %c1_i32 : i32
    %1 = arith.addi %0, %arg1 : i32
    %c0_i32 = arith.constant 0 : i32
    %2 = arith.minsi %1, %c0_i32 : i32
    %c0_i32_0 = arith.constant 0 : i32
    %c0_i32_1 = arith.constant 0 : i32
    return %2, %c0_i32_0 : i32, i32
  }
  func.func @transform_1(%arg0: i32, %arg1: i32) -> (i32, i32) {
    %c0_i32 = arith.constant 0 : i32
    %c0_i32_0 = arith.constant 0 : i32
    %c0_i32_1 = arith.constant 0 : i32
    return %c0_i32, %c0_i32_0 : i32, i32
  }
  func.func @transform_2(%arg0: i32, %arg1: i32) -> (i32, i32) {
    %c0_i32 = arith.constant 0 : i32
    %c0_i32_0 = arith.constant 0 : i32
    %c0_i32_1 = arith.constant 0 : i32
    return %c0_i32, %c0_i32_0 : i32, i32
  }
  func.func @transform_3(%arg0: i32, %arg1: i32) -> (i32, i32) {
    %c1_i32 = arith.constant 1 : i32
    %0 = arith.muli %arg0, %c1_i32 : i32
    %1 = arith.addi %0, %arg1 : i32
    %c0_i32 = arith.constant 0 : i32
    %2 = arith.minsi %1, %c0_i32 : i32
    %c0_i32_0 = arith.constant 0 : i32
    %c0_i32_1 = arith.constant 0 : i32
    return %2, %c0_i32_0 : i32, i32
  }
  func.func @transform_4(%arg0: i32, %arg1: i32) -> (i32, i32, i32) {
    %c0_i32 = arith.constant 0 : i32
    %c0_i32_0 = arith.constant 0 : i32
    %c0_i32_1 = arith.constant 0 : i32
    return %arg0, %c0_i32, %c0_i32_0 : i32, i32, i32
  }
}

</mosaic_0001>

<bundles_post_ra>
// kernel: tpu_custom_call.1
= control target key start
LH: loop header
LB: loop body
LE: loop exit
PB: predicated region body
PF: predicated region fallthrough
CT: control target
= control target key end

     0   :  { %vm99_vm0 = vcmask 261120   ;;  %v318_v5 = vmov 0   ;;  %s388_s0 = inlined_call_operand.vmem [shape: f32[16,32], index: 0, kind: input, shape index: {}]   ;;  %s389_s1 = inlined_call_operand.vmem [shape: f32[32,3], index: 1, kind: input, shape index: {}]   ;;  %s390_s2 = inlined_call_operand.vmem [shape: f32[1,3], index: 2, kind: input, shape index: {}]   ;;  %s391_s3 = inlined_call_operand.vmem [shape: s32[16,1], index: 3, kind: input, shape index: {}]   ;;  %s392_s4 = inlined_call_operand.hbm [shape: f32[1,1,1], index: 4, kind: output, shape index: {}]  }
   0x1   :  { %v93_v0 = vld [vmem:[%s389_s1 + $0x18] sm:$0xff]  ;;  %v92_v1 = vld [vmem:[%s389_s1 + $0x10] sm:$0xff]  ;;  %v88_v2 = vld [vmem:[%s388_s0] sm:$0xff]  ;;  %277 = vset.pattern.permute.xlu2 %v318_v5  ;;  %278 = vset.pattern.permute.xlu0 %v318_v5 }
   0x2   :  { %124 = vmatpush.msra.mxu0 %v93_v0  ;;  %270 = vmatpush.msra.mxu1 %v93_v0  ;;  %v91_v3 = vld [vmem:[%s389_s1 + $0x8] sm:$0xff]  ;;  %v97_v4 = vmul.f32 %v88_v2, %v88_v2  ;;  %v95_v6 = vld [vmem:[%s391_s3] sm:$0xff] }
   0x4   :  { %125 = vmatpush.msra.mxu0 %v92_v1  ;;  %271 = vmatpush.msra.mxu1 %v92_v1 }
   0x5   :  { %9 = vsyncpa [#allocation3], 0  ;;  %v90_v7 = vld [vmem:[%s389_s1] sm:$0xff]  ;;  %v100_v8 = vsel %vm99_vm0, %v97_v4, 0.0  ;;  %175 = vperm.xlu2 %277, %v95_v6   ;;  %v89_v9 = vld [vmem:[%s388_s0 + $0x8] sm:$0xff]  ;;  %v172_v33 = vlaneseq  ;;  %vm184_vm4 = vcmask 23552  }
   0x6   :  { %126 = vmatpush.msra.mxu0 %v91_v3  ;;  %272 = vmatpush.msra.mxu1 %v91_v3  ;;  %v98_v10 = vmul.f32 %v89_v9, %v89_v9  ;;  %v96_v11 = vld [vmem:[%s391_s3 + $0x8] sm:$0xff]  ;;  %v279_v14 = vld [vmem:[%s390_s2] ss:$0 sm:$0xff]  ;;  %vm86_vm8 = vcmask 0   ;;  %v319_v4 = vmov 0.0   ;;  %s320_s0 = smov [#allocation2]  }
   0x7   :  { %101 = vadd.xlane.f32.xlu0 %v100_v8  ;;  %v173_v38 = vand.u32 127, %v172_v33  ;;  %87 = vst.msk [vmem:[#allocation2] sm:$0x1] %vm86_vm8, %v319_v4  ;;  %s245_s2 = sshll.u32 %s320_s0, 4  ;;  %s247_s7 = sshll.u32 %s392_s4, 4  ;;  %s246_s2 = int_to_ptr.vmem [resolvable:$true] %s245_s2  ;;  %s248_s7 = int_to_ptr.hbm [resolvable:$true] %s247_s7 }
   0x8   :  { %127 = vmatpush.msra.mxu0 %v90_v7  ;;  %273 = vmatpush.msra.mxu1 %v90_v7  ;;  %v103_v12 = vsel %vm99_vm0, %v98_v10, 0.0 }
   0x9   :  { %268 = vmatmul.msk.f32.vlgmr.msra.gmra.mxu0 %vm99_vm0, %v88_v2  ;;  %269 = vmatmul.msk.f32.vlgmr.msra.gmra.mxu1 %vm99_vm0, %v89_v9 }
   0xd   :  { %178 = vperm.xlu2 %277, %v96_v11  }
   0xf   :  { %104 = vadd.xlane.f32.xlu0 %v103_v12 }
  0x5f   :  { %v176_v43 = vpop.permute.xlu2 %175 }
  0x60   :  { %vm180_vm3 = vcmp.eq.s32.totalorder %v173_v38, %v176_v43 }
  0x67   :  { %v179_v61 = vpop.permute.xlu2 %178 }
  0x68   :  { %vm181_vm7 = vcmp.eq.s32.totalorder %v173_v38, %v179_v61 }
  0x7a   :  { %v102_v13 = vpop.xlane.xlu0 %101 }
  0x7b   :  { %v138_v16 = vadd.f32 %v279_v14, %v102_v13 }
  0x82   :  { %v105_v15 = vpop.xlane.xlu0 %104 }
  0x83   :  { %v139_v17 = vadd.f32 %v279_v14, %v105_v15 }
  0x86   :  { %v129_v18 = vpop.f32.mrf.mxu0  ;;  %v132_v19 = vpop.f32.mrf.mxu1 }
  0x87   :  { %v140_v20 = vmul.f32 2.0, %v129_v18  ;;  %v141_v21 = vmul.f32 2.0, %v132_v19 }
  0x89   :  { %v142_v22 = vsub.f32 %v138_v16, %v140_v20  ;;  %v143_v23 = vsub.f32 %v139_v17, %v141_v21 }
  0x8b   :  { %v144_v24 = vmax.f32 %v142_v22, 0.0  ;;  %v145_v25 = vmax.f32 %v143_v23, 0.0  ;;  %v229_v23 = vld [vmem:[#allocation2] sm:$0x1] }
  0x8d   :  { %280 = vrsqrt.f32 %v144_v24  ;;  %vm153_vm1 = vcmp.eq.f32.partialorder %v144_v24, inf  ;;  %v156_v41 = vand.u32 2147483648, %v144_v24  ;;  %vm155_vm2 = vcmp.eq.f32.partialorder %v144_v24, 0.0 }
  0x8e   :  { %282 = vrsqrt.f32 %v145_v25  ;;  %vm165_vm5 = vcmp.eq.f32.partialorder %v145_v25, inf  ;;  %v168_v48 = vand.u32 2147483648, %v145_v25  ;;  %vm167_vm6 = vcmp.eq.f32.partialorder %v145_v25, 0.0 }
  0x93   :  { %v281_v26 = vpop.eup %280 }
  0x94   :  { %v283_v27 = vpop.eup %282  ;;  %v147_v28 = vmul.f32 %v281_v26, %v144_v24 }
  0x95   :  { %v159_v29 = vmul.f32 %v283_v27, %v145_v25 }
  0x96   :  { %v148_v30 = vmul.f32 %v281_v26, %v147_v28 }
  0x97   :  { %v160_v31 = vmul.f32 %v283_v27, %v159_v29 }
  0x98   :  { %v149_v32 = vmul.f32 0.5, %v148_v30 }
  0x99   :  { %v161_v34 = vmul.f32 0.5, %v160_v31 }
  0x9a   :  { %v150_v35 = vsub.f32 1.5, %v149_v32 }
  0x9b   :  { %v162_v36 = vsub.f32 1.5, %v161_v34 }
  0x9c   :  { %v151_v37 = vmul.f32 %v281_v26, %v150_v35 }
  0x9d   :  { %v163_v39 = vmul.f32 %v283_v27, %v162_v36 }
  0x9e   :  { %v152_v40 = vmul.f32 %v151_v37, %v144_v24 }
  0x9f   :  { %v164_v42 = vmul.f32 %v163_v39, %v145_v25 }
  0xa0   :  { %v154_v44 = vsel %vm153_vm1, %v144_v24, %v152_v40 }
  0xa1   :  { %v157_v45 = vsel %vm155_vm2, %v156_v41, %v154_v44  ;;  %v166_v47 = vsel %vm165_vm5, %v145_v25, %v164_v42 }
  0xa2   :  { %v170_v46 = vsub.f32 0.0, %v157_v45  ;;  %v169_v52 = vsel %vm167_vm6, %v168_v48, %v166_v47 }
  0xa3   :  { %v171_v53 = vsub.f32 0.0, %v169_v52 }
  0xa4   :  { %v191_v49 = vsel %vm184_vm4, %v170_v46, -inf  ;;  %v182_v50 = vsel %vm180_vm3, %v170_v46, 0.0 }
  0xa5   :  { %192 = vmax.xlane.f32.xlu1 %v191_v49  ;;  %v185_v51 = vsel %vm184_vm4, %v182_v50, 0.0  ;;  %v194_v54 = vsel %vm184_vm4, %v171_v53, -inf  ;;  %v183_v0 = vsel %vm181_vm7, %v171_v53, 0.0 }
  0xa6   :  { %186 = vadd.xlane.f32.xlu2 %v185_v51  ;;  %v188_v3 = vsel %vm184_vm4, %v183_v0, 0.0 }
  0xad   :  { %195 = vmax.xlane.f32.xlu1 %v194_v54 }
 0x118   :  { %v193_v55 = vpop.xlane.xlu1 %192 }
 0x119   :  { %v197_v56 = vsub.f32 %v170_v46, %v193_v55  ;;  %v187_v13 = vpop.xlane.xlu2 %186 }
 0x11b   :  { %v199_v57 = vmul.f32 1.442695, %v197_v56 }
 0x11d   :  { %284 = vpow2.f32 %v199_v57 }
 0x120   :  { %v196_v58 = vpop.xlane.xlu1 %195 }
 0x121   :  { %v198_v59 = vsub.f32 %v171_v53, %v196_v58 }
 0x123   :  { %v285_v60 = vpop.eup %284  ;;  %v201_v62 = vmul.f32 1.442695, %v198_v59 }
 0x124   :  { %v203_v63 = vsel %vm184_vm4, %v285_v60, 0.0 }
 0x125   :  { %286 = vpow2.f32 %v201_v62  ;;  %204 = vadd.xlane.f32.xlu0 %v203_v63 }
 0x12b   :  { %v287_v1 = vpop.eup %286 }
 0x12c   :  { %v206_v2 = vsel %vm184_vm4, %v287_v1, 0.0 }
 0x12d   :  { %207 = vadd.xlane.f32.xlu1 %v206_v2  ;;  %189 = vadd.xlane.f32.xlu0 %v188_v3 }
 0x198   :  { %v205_v5 = vpop.xlane.xlu0 %204 }
 0x199   :  { %288 = vlog2.f32 %v205_v5 }
 0x19f   :  { %v289_v7 = vpop.eup %288 }
 0x1a0   :  { %v208_v6 = vpop.xlane.xlu1 %207  ;;  %v210_v8 = vmul.f32 0.6931472, %v289_v7  ;;  %v190_v14 = vpop.xlane.xlu0 %189 }
 0x1a1   :  { %290 = vlog2.f32 %v208_v6 }
 0x1a2   :  { %v213_v10 = vadd.f32 %v210_v8, %v193_v55 }
 0x1a4   :  { %v215_v15 = vsub.f32 %v213_v10, %v187_v13 }
 0x1a7   :  { %v291_v9 = vpop.eup %290 }
 0x1a8   :  { %v212_v11 = vmul.f32 0.6931472, %v291_v9 }
 0x1aa   :  { %v214_v12 = vadd.f32 %v212_v11, %v196_v58 }
 0x1ac   :  { %v216_v16 = vsub.f32 %v214_v12, %v190_v14 }
 0x1ae   :  { %v230_v17 = vadd.f32 %v216_v16, %v215_v15 }
 0x1b0   :  { %v231_v18 = vrot.slane %v230_v17, 4 }
 0x1b2   :  { %v232_v19 = vadd.f32 %v231_v18, %v230_v17 }
 0x1b4   :  { %v233_v20 = vrot.slane %v232_v19, 2 }
 0x1b6   :  { %v234_v21 = vadd.f32 %v233_v20, %v232_v19 }
 0x1b8   :  { %v235_v22 = vrot.slane %v234_v21, 1 }
 0x1ba   :  { %v236_v24 = vadd.f32 %v235_v22, %v234_v21 }
 0x1bc   :  { %v237_v25 = vadd.f32 %v236_v24, %v229_v23 }
 0x1be   :  { %239 = vst.msk [vmem:[#allocation2] sm:$0x1] %vm86_vm8, %v237_v25 }
 0x1bf   :  { %250 = dma.vmem_to_hbm [thread:$0]  %s246_s2, 16, %s248_s7, [#allocation3]  }
 0x1c0   :  { %316 = dma.done.wait [#allocation3], 16  }
 0x1c1   :  { %317 = vsyncadd [#allocation3], 4294967280 }
 0x1c2   :  { %255 = vsyncpa [#allocation3], 1 }

</bundles_post_ra>
